<compile_context>
chip_gen: v7x
topology: tpu7x:2x2x1
jax: 0.10.0
libtpu: 0.0.40
codegen_flags: <defaults>
</compile_context>

<pallas_src>
import jax
import jax.numpy as jnp
from jax.experimental import pallas as pl
from jax.experimental.pallas import tpu as pltpu

TBLK_MAX = 2048  # triples per grid step; multiple of 128


def _dotmult_kernel(s_ref, o_ref, out_ref):
    # s_ref / o_ref: (TBLK, D) gathered embedding rows (triples on sublanes,
    # embedding dim on lanes).  Upcast on load (bf16 or f32 tables), VPU
    # multiply in f32, XLU cross-lane reduce -> (TBLK, 1).
    prod = s_ref[...].astype(jnp.float32) * o_ref[...].astype(jnp.float32)
    out_ref[...] = jnp.sum(prod, axis=-1, keepdims=True)


def _round_up(x, m):
    return ((x + m - 1) // m) * m


@jax.jit
def dotmult_forward(triples, nodes):
    """triples: [T, 3] int (s, p, o); nodes: [N, D] f32/bf16 -> scores [T] f32."""
    T = triples.shape[0]
    N, D = nodes.shape

    if T == 0:
        return jnp.zeros((0,), jnp.float32)

    # Clamp indices so a malformed triple cannot gather out of range.
    s_index = jnp.clip(triples[:, 0].astype(jnp.int32), 0, N - 1)
    o_index = jnp.clip(triples[:, 2].astype(jnp.int32), 0, N - 1)

    tblk = min(TBLK_MAX, _round_up(T, 128))
    num_blocks = pl.cdiv(T, tblk)
    t_pad = num_blocks * tblk
    if t_pad != T:  # pad with index 0; padded scores are sliced away below
        s_index = jnp.pad(s_index, (0, t_pad - T))
        o_index = jnp.pad(o_index, (0, t_pad - T))

    # Row gather in the natural (t_pad, D) layout — no transpose pass, and the
    # node-table dtype (f32 or bf16) is preserved through HBM.
    s_rows = jnp.take(nodes, s_index, axis=0)
    o_rows = jnp.take(nodes, o_index, axis=0)

    grid_spec = pl.GridSpec(
        grid=(num_blocks,),
        in_specs=[
            pl.BlockSpec((tblk, D), lambda i: (i, 0)),
            pl.BlockSpec((tblk, D), lambda i: (i, 0)),
        ],
        out_specs=pl.BlockSpec((tblk, 1), lambda i: (i, 0)),
    )

    out = pl.pallas_call(
        _dotmult_kernel,
        out_shape=jax.ShapeDtypeStruct((t_pad, 1), jnp.float32),
        grid_spec=grid_spec,
        compiler_params=pltpu.CompilerParams(
            dimension_semantics=("parallel",),   # independent tiles -> 2 TCs on v7x
            vmem_limit_bytes=32 * 1024 * 1024,   # ~4 MiB actually used at D=128
        ),
    )(s_rows, o_rows)

    return out[:T, 0]


if __name__ == "__main__":
    key = jax.random.PRNGKey(0)
    num_nodes, emb_dim, num_triples = 16, 128, 8
    k1, k2, k3 = jax.random.split(key, 3)

    # DotMult(num_nodes) with the default b_init=None registers no parameters
    # (sbias/obias are None).  Node embeddings come from the encoder; we
    # synthesize them deterministically ('standard-normal' style).
    nodes = jax.random.normal(k1, (num_nodes, emb_dim), dtype=jnp.float32)

    s = jax.random.randint(k2, (num_triples,), 0, num_nodes, dtype=jnp.int32)
    o = jax.random.randint(k3, (num_triples,), 0, num_nodes, dtype=jnp.int32)
    p = jnp.zeros((num_triples,), jnp.int32)   # predicate index is unused
    triples = jnp.stack([s, p, o], axis=1)

    # f32 path — matches the PyTorch module exactly.
    scores = jax.block_until_ready(dotmult_forward(triples, nodes))
    ref = jnp.sum(nodes[triples[:, 0], :] * nodes[triples[:, 2], :], axis=-1)
    assert scores.shape == (num_triples,)
    assert jnp.allclose(scores, ref, atol=1e-5), (scores, ref)

    # bf16 node table path — traffic-halving variant; kernel upcasts in f32.
    nodes_bf16 = nodes.astype(jnp.bfloat16)
    scores_bf16 = jax.block_until_ready(dotmult_forward(triples, nodes_bf16))
    ref_bf16 = jnp.sum(
        nodes_bf16[triples[:, 0], :].astype(jnp.float32)
        * nodes_bf16[triples[:, 2], :].astype(jnp.float32),
        axis=-1,
    )
    assert jnp.allclose(scores_bf16, ref_bf16, atol=1e-2), (scores_bf16, ref_bf16)

    print("KERNEL_OK")
</pallas_src>

<mosaic_0001>
module attributes {stable_mosaic.version = 11 : i64} {
  func.func @_dotmult_kernel(%arg0: i32, %arg1: memref<128x128xf32, #tpu.memory_space<vmem>>, %arg2: memref<128x128xf32, #tpu.memory_space<vmem>>, %arg3: memref<128x1xf32, #tpu.memory_space<vmem>>) attributes {dimension_semantics = [#tpu.dimension_semantics<parallel>], iteration_bounds = array<i64: 1>, scalar_prefetch = 0 : i64, scratch_operands = 0 : i64, tpu.core_type = #tpu.core_type<tc>, window_params = [{transform_indices = @transform_0, window_bounds = array<i64: 128, 128>}, {transform_indices = @transform_1, window_bounds = array<i64: 128, 128>}, {transform_indices = @transform_2, window_bounds = array<i64: 128, 1>}]} {
    %c0 = arith.constant 0 : index
    %c0_0 = arith.constant 0 : index
    %0 = vector.load %arg1[%c0, %c0_0] : memref<128x128xf32, #tpu.memory_space<vmem>>, vector<128x128xf32>
    %c0_1 = arith.constant 0 : index
    %c0_2 = arith.constant 0 : index
    %1 = vector.load %arg2[%c0_1, %c0_2] : memref<128x128xf32, #tpu.memory_space<vmem>>, vector<128x128xf32>
    %2 = arith.mulf %0, %1 : vector<128x128xf32>
    %cst = arith.constant dense<0.000000e+00> : vector<128xf32>
    %3 = vector.multi_reduction <add>, %2, %cst [1] : vector<128x128xf32> to vector<128xf32>
    %4 = vector.shape_cast %3 : vector<128xf32> to vector<128x1xf32>
    %c0_3 = arith.constant 0 : index
    %c0_4 = arith.constant 0 : index
    %5 = vector.load %arg3[%c0_3, %c0_4] : memref<128x1xf32, #tpu.memory_space<vmem>>, vector<128x1xf32>
    tpu.vector_store %arg3[%c0_3, %c0_4], %4 {strides = array<i32>} : memref<128x1xf32, #tpu.memory_space<vmem>>, vector<128x1xf32>,
    return
  }
  func.func @transform_0(%arg0: i32) -> (i32, i32) {
    %c0_i32 = arith.constant 0 : i32
    %c0_i32_0 = arith.constant 0 : i32
    return %arg0, %c0_i32 : i32, i32
  }
  func.func @transform_1(%arg0: i32) -> (i32, i32) {
    %c0_i32 = arith.constant 0 : i32
    %c0_i32_0 = arith.constant 0 : i32
    return %arg0, %c0_i32 : i32, i32
  }
  func.func @transform_2(%arg0: i32) -> (i32, i32) {
    %c0_i32 = arith.constant 0 : i32
    %c0_i32_0 = arith.constant 0 : i32
    return %arg0, %c0_i32 : i32, i32
  }
}

</mosaic_0001>

<bundles_post_ra>
// kernel: dotmult_forward.1
= control target key start
LH: loop header
LB: loop body
LE: loop exit
PB: predicated region body
PF: predicated region fallthrough
CT: control target
= control target key end

     0   :  { %vm91_vm0 = vcmask 7168   ;;  %s287_s0 = inlined_call_operand.vmem [shape: f32[128,128], index: 0, kind: input, shape index: {}]   ;;  %s288_s1 = inlined_call_operand.vmem [shape: f32[128,128], index: 1, kind: input, shape index: {}]   ;;  %s289_s2 = inlined_call_operand.vmem [shape: f32[128,1], index: 2, kind: output, shape index: {}]  }
   0x1   :  { %v13_v0 = vld [vmem:[%s287_s0 + $0x10] sm:$0xff]  ;;  %v11_v2 = vld [vmem:[%s287_s0] sm:$0xff]  ;;  %v14_v5 = vld [vmem:[%s287_s0 + $0x18] sm:$0xff] }
   0x2   :  { %v29_v1 = vld [vmem:[%s288_s1 + $0x10] sm:$0xff]  ;;  %v27_v4 = vld [vmem:[%s288_s1] sm:$0xff]  ;;  %v30_v6 = vld [vmem:[%s288_s1 + $0x18] sm:$0xff] }
   0x3   :  { %v45_v3 = vmul.f32 %v29_v1, %v13_v0  ;;  %v43_v7 = vmul.f32 %v27_v4, %v11_v2  ;;  %v12_v8 = vld [vmem:[%s287_s0 + $0x8] sm:$0xff]  ;;  %v46_v10 = vmul.f32 %v30_v6, %v14_v5  ;;  %v15_v14 = vld [vmem:[%s287_s0 + $0x20] sm:$0xff]  ;;  %v18_v18 = vld [vmem:[%s287_s0 + $0x38] sm:$0xff] }
   0x4   :  { %v28_v9 = vld [vmem:[%s288_s1 + $0x8] sm:$0xff]  ;;  %v31_v15 = vld [vmem:[%s288_s1 + $0x20] sm:$0xff]  ;;  %v34_v19 = vld [vmem:[%s288_s1 + $0x38] sm:$0xff] }
   0x5   :  { %63 = vadd.xlane.f32.xlu1 %v45_v3  ;;  %59 = vadd.xlane.f32.xlu0 %v43_v7  ;;  %v44_v11 = vmul.f32 %v28_v9, %v12_v8  ;;  %v16_v12 = vld [vmem:[%s287_s0 + $0x28] sm:$0xff]  ;;  %v47_v17 = vmul.f32 %v31_v15, %v15_v14  ;;  %v17_v20 = vld [vmem:[%s287_s0 + $0x30] sm:$0xff]  ;;  %v50_v22 = vmul.f32 %v34_v19, %v18_v18  ;;  %v19_v26 = vld [vmem:[%s287_s0 + $0x40] sm:$0xff] }
   0x6   :  { %v32_v13 = vld [vmem:[%s288_s1 + $0x28] sm:$0xff]  ;;  %v33_v21 = vld [vmem:[%s288_s1 + $0x30] sm:$0xff]  ;;  %v35_v27 = vld [vmem:[%s288_s1 + $0x40] sm:$0xff] }
   0x7   :  { %v48_v16 = vmul.f32 %v32_v13, %v16_v12  ;;  %v49_v23 = vmul.f32 %v33_v21, %v17_v20  ;;  %v20_v24 = vld [vmem:[%s287_s0 + $0x48] sm:$0xff]  ;;  %v51_v29 = vmul.f32 %v35_v27, %v19_v26  ;;  %v22_v30 = vld [vmem:[%s287_s0 + $0x58] sm:$0xff]  ;;  %v21_v32 = vld [vmem:[%s287_s0 + $0x50] sm:$0xff] }
   0x8   :  { %v36_v25 = vld [vmem:[%s288_s1 + $0x48] sm:$0xff]  ;;  %v38_v31 = vld [vmem:[%s288_s1 + $0x58] sm:$0xff]  ;;  %v37_v33 = vld [vmem:[%s288_s1 + $0x50] sm:$0xff] }
   0x9   :  { %65 = vadd.xlane.f32.xlu1 %v46_v10  ;;  %61 = vadd.xlane.f32.xlu0 %v44_v11  ;;  %v52_v28 = vmul.f32 %v36_v25, %v20_v24  ;;  %v54_v34 = vmul.f32 %v38_v31, %v22_v30  ;;  %v53_v35 = vmul.f32 %v37_v33, %v21_v32  ;;  %v24_v36 = vld [vmem:[%s287_s0 + $0x68] sm:$0xff]  ;;  %v23_v38 = vld [vmem:[%s287_s0 + $0x60] sm:$0xff]  ;;  %v26_v42 = vld [vmem:[%s287_s0 + $0x78] sm:$0xff] }
   0xa   :  { %v40_v37 = vld [vmem:[%s288_s1 + $0x68] sm:$0xff]  ;;  %v39_v39 = vld [vmem:[%s288_s1 + $0x60] sm:$0xff]  ;;  %v42_v43 = vld [vmem:[%s288_s1 + $0x78] sm:$0xff] }
   0xb   :  { %v56_v40 = vmul.f32 %v40_v37, %v24_v36  ;;  %v55_v41 = vmul.f32 %v39_v39, %v23_v38  ;;  %v25_v44 = vld [vmem:[%s287_s0 + $0x70] sm:$0xff]  ;;  %v58_v46 = vmul.f32 %v42_v43, %v26_v42 }
   0xc   :  { %v41_v45 = vld [vmem:[%s288_s1 + $0x70] sm:$0xff] }
   0xd   :  { %69 = vadd.xlane.f32.xlu1 %v48_v16  ;;  %67 = vadd.xlane.f32.xlu0 %v47_v17  ;;  %v57_v47 = vmul.f32 %v41_v45, %v25_v44 }
  0x11   :  { %73 = vadd.xlane.f32.xlu1 %v50_v22  ;;  %71 = vadd.xlane.f32.xlu0 %v49_v23 }
  0x15   :  { %77 = vadd.xlane.f32.xlu1 %v52_v28  ;;  %75 = vadd.xlane.f32.xlu0 %v51_v29 }
  0x19   :  { %81 = vadd.xlane.f32.xlu1 %v54_v34  ;;  %79 = vadd.xlane.f32.xlu0 %v53_v35 }
  0x1d   :  { %85 = vadd.xlane.f32.xlu1 %v56_v40  ;;  %83 = vadd.xlane.f32.xlu0 %v55_v41 }
  0x21   :  { %89 = vadd.xlane.f32.xlu1 %v58_v46  ;;  %87 = vadd.xlane.f32.xlu0 %v57_v47 }
  0x92   :  { %v64_v48 = vpop.xlane.xlu1 %63  ;;  %v60_v49 = vpop.xlane.xlu0 %59 }
  0x93   :  { %94 = vst.msk [vmem:[%s289_s2 + $0x10] sm:$0xff] %vm91_vm0, %v64_v48  ;;  %92 = vst.msk [vmem:[%s289_s2] sm:$0xff] %vm91_vm0, %v60_v49 }
  0x96   :  { %v66_v50 = vpop.xlane.xlu1 %65  ;;  %v62_v51 = vpop.xlane.xlu0 %61 }
  0x97   :  { %95 = vst.msk [vmem:[%s289_s2 + $0x18] sm:$0xff] %vm91_vm0, %v66_v50  ;;  %93 = vst.msk [vmem:[%s289_s2 + $0x8] sm:$0xff] %vm91_vm0, %v62_v51 }
  0x9a   :  { %v70_v52 = vpop.xlane.xlu1 %69  ;;  %v68_v53 = vpop.xlane.xlu0 %67 }
  0x9b   :  { %97 = vst.msk [vmem:[%s289_s2 + $0x28] sm:$0xff] %vm91_vm0, %v70_v52  ;;  %96 = vst.msk [vmem:[%s289_s2 + $0x20] sm:$0xff] %vm91_vm0, %v68_v53 }
  0x9e   :  { %v74_v54 = vpop.xlane.xlu1 %73  ;;  %v72_v55 = vpop.xlane.xlu0 %71 }
  0x9f   :  { %99 = vst.msk [vmem:[%s289_s2 + $0x38] sm:$0xff] %vm91_vm0, %v74_v54  ;;  %98 = vst.msk [vmem:[%s289_s2 + $0x30] sm:$0xff] %vm91_vm0, %v72_v55 }
  0xa2   :  { %v78_v56 = vpop.xlane.xlu1 %77  ;;  %v76_v57 = vpop.xlane.xlu0 %75 }
  0xa3   :  { %101 = vst.msk [vmem:[%s289_s2 + $0x48] sm:$0xff] %vm91_vm0, %v78_v56  ;;  %100 = vst.msk [vmem:[%s289_s2 + $0x40] sm:$0xff] %vm91_vm0, %v76_v57 }
  0xa6   :  { %v82_v58 = vpop.xlane.xlu1 %81  ;;  %v80_v59 = vpop.xlane.xlu0 %79 }
  0xa7   :  { %103 = vst.msk [vmem:[%s289_s2 + $0x58] sm:$0xff] %vm91_vm0, %v82_v58  ;;  %102 = vst.msk [vmem:[%s289_s2 + $0x50] sm:$0xff] %vm91_vm0, %v80_v59 }
  0xaa   :  { %v86_v60 = vpop.xlane.xlu1 %85  ;;  %v84_v61 = vpop.xlane.xlu0 %83 }
  0xab   :  { %105 = vst.msk [vmem:[%s289_s2 + $0x68] sm:$0xff] %vm91_vm0, %v86_v60  ;;  %104 = vst.msk [vmem:[%s289_s2 + $0x60] sm:$0xff] %vm91_vm0, %v84_v61 }
  0xae   :  { %v90_v62 = vpop.xlane.xlu1 %89  ;;  %v88_v63 = vpop.xlane.xlu0 %87 }
  0xaf   :  { %107 = vst.msk [vmem:[%s289_s2 + $0x78] sm:$0xff] %vm91_vm0, %v90_v62  ;;  %106 = vst.msk [vmem:[%s289_s2 + $0x70] sm:$0xff] %vm91_vm0, %v88_v63 }

</bundles_post_ra>
